<compile_context>
chip_gen: v7x
topology: tpu7x:2x2x1
jax: 0.10.0
libtpu: 0.0.40
codegen_flags: <defaults>
</compile_context>

<pallas_src>
import jax
import jax.numpy as jnp
from jax import lax
from jax.experimental import pallas as pl
from jax.experimental.pallas import tpu as pltpu


# ---------------- model hyper-params (small, consistent with the module) ------------
B, C_IN, H, W = 2, 4, 16, 16          # input  x: [B, C_in, H, W]  (NCHW)
KH, KW = 3, 3                         # stand-in backbone conv kernel
REDUCTION_DIM = 32                    # cfg.MODEL.HEADS.REDUCTION_DIM (backbone out channels)
NUM_CLASSES = 10                      # cfg.MODEL.NUM_CLASSES
HW = H * W                            # 256 rows per batch
K_TAPS = KH * KW * C_IN               # 36 real contraction dims of the fused conv matmul
K_PAD = 128                           # lane-padded contraction dim (36 conv + 1 bias + zeros)
RD_PAD = 128                          # lane-padded REDUCTION_DIM
NC_PAD = 128                          # lane-padded NUM_CLASSES
B_PAD = 8                             # sublane-padded batch (full (8,128) output tiles)
BIAS_ROW = K_TAPS                     # wc row 36 holds the conv bias (patches col 36 == 1)
ONE_LANE = REDUCTION_DIM              # conv-output lane 32 carries a constant 1 -> fc-bias hook


# ---------------- Pallas kernel: fused conv(+bias) + ReLU + avg-pool + fc(+bias) -----
def base_kernel(p_ref, wc_ref, wf_ref, feat_ref, out_ref):
    # p_ref   : (B*HW, K_PAD)   im2col patches; col 36 = 1.0, cols 37.. = 0
    # wc_ref  : (K_PAD, RD_PAD) fused conv weight; row 36 = conv bias, [36, 32] = 1.0
    # wf_ref  : (RD_PAD, NC_PAD) fc weight (transposed); row 32 = fc bias
    # feat_ref: (B_PAD, RD_PAD) pooled feature (padded; lane 32 is the constant-1 channel)
    # out_ref : (B_PAD, NC_PAD) logits (padded)

    def batch_chunk(b, feat_acc):
        # one batch = one 256-row chunk: <=32 vregs live, pooling is a free row-sum
        start = pl.multiple_of(b * HW, HW)
        rows = p_ref[pl.ds(start, HW), :]                              # [HW, K_PAD]
        conv = jnp.maximum(
            jnp.dot(rows, wc_ref[...], preferred_element_type=jnp.float32), 0.0)
        pooled = jnp.sum(conv, axis=0, keepdims=True) * (1.0 / HW)     # [1, RD_PAD]
        row_ids = lax.broadcasted_iota(jnp.int32, (B_PAD, RD_PAD), 0)
        return feat_acc + jnp.where(row_ids == b, pooled, 0.0)

    feat = lax.fori_loop(0, B, batch_chunk,
                         jnp.zeros((B_PAD, RD_PAD), jnp.float32))
    feat_ref[...] = feat
    # fc: bias rides on feat's constant-1 lane (wf row 32 = b_fc)
    out_ref[...] = jnp.dot(feat, wf_ref[...], preferred_element_type=jnp.float32)


# ---------------- cost hint for the XLA scheduler -------------------------------------
_FLOPS = (2 * B * HW * K_PAD * RD_PAD         # fused conv matmul (per-batch chunks)
          + 2 * B_PAD * RD_PAD * NC_PAD)      # fc matmul
_BYTES = 4 * (B * HW * K_PAD                  # patches
              + K_PAD * RD_PAD                # conv weight
              + RD_PAD * NC_PAD               # fc weight
              + B_PAD * RD_PAD                # feat out
              + B_PAD * NC_PAD)               # logits out


def base_forward(x_nchw, w_conv, b_conv, w_fc, b_fc):
    """x_nchw: [B, C_in, H, W] float32. Returns (feat [B, RD], logits [B, NC])."""
    # ----- layout plumbing only: NCHW -> NHWC, SAME pad, im2col, bias folding ---------
    x_nhwc = jnp.transpose(x_nchw, (0, 2, 3, 1))                        # [B, H, W, Cin]
    x_pad = jnp.pad(x_nhwc, ((0, 0), (1, 1), (1, 1), (0, 0)))           # SAME pad for 3x3

    # im2col: lane-dense [B*HW, K_PAD] with a ones column for the conv bias
    taps = [x_pad[:, kh:kh + H, kw:kw + W, :].reshape(B * HW, C_IN)
            for kh in range(KH) for kw in range(KW)]
    patches = jnp.concatenate(taps + [jnp.ones((B * HW, 1), jnp.float32)], axis=1)
    patches = jnp.pad(patches, ((0, 0), (0, K_PAD - (K_TAPS + 1))))     # [B*HW, 128]

    # conv weight: torch [Cout, Cin, KH, KW] -> [KH*KW*Cin, Cout], append bias row,
    # pad to [128, 128]; [36, 32] = 1 makes conv lane 32 a constant 1 (fc-bias hook).
    wc = jnp.transpose(w_conv, (2, 3, 1, 0)).reshape(K_TAPS, REDUCTION_DIM)
    wc = jnp.concatenate([wc, b_conv.reshape(1, REDUCTION_DIM)], axis=0)
    wc = jnp.pad(wc, ((0, K_PAD - (K_TAPS + 1)), (0, RD_PAD - REDUCTION_DIM)))
    wc = wc.at[BIAS_ROW, ONE_LANE].set(1.0)

    # fc weight: torch [NC, RD], y = x @ W.T + b -> [RD, NC] with bias as row 32, pad.
    wf = jnp.concatenate([jnp.transpose(w_fc), b_fc.reshape(1, NUM_CLASSES)], axis=0)
    wf = jnp.pad(wf, ((0, RD_PAD - (REDUCTION_DIM + 1)), (0, NC_PAD - NUM_CLASSES)))

    vmem = pl.BlockSpec(memory_space=pltpu.MemorySpace.VMEM)
    feat_p, logits_p = pl.pallas_call(
        base_kernel,
        out_shape=(
            jax.ShapeDtypeStruct((B_PAD, RD_PAD), jnp.float32),
            jax.ShapeDtypeStruct((B_PAD, NC_PAD), jnp.float32),
        ),
        in_specs=[vmem, vmem, vmem],
        out_specs=(vmem, vmem),
        cost_estimate=pl.CostEstimate(flops=_FLOPS, transcendentals=0,
                                      bytes_accessed=_BYTES),
    )(patches, wc, wf)

    # slice sublane/lane padding back off (layout plumbing)
    return feat_p[:B, :REDUCTION_DIM], logits_p[:B, :NUM_CLASSES]


# ---------------- pure-JAX reference for correctness ---------------------------------
def _reference(x, w_conv, b_conv, w_fc, b_fc):
    xn = jnp.transpose(x, (0, 2, 3, 1))
    xp = jnp.pad(xn, ((0, 0), (1, 1), (1, 1), (0, 0)))
    conv = jnp.zeros((B, H, W, REDUCTION_DIM), jnp.float32)
    for kh in range(KH):
        for kw in range(KW):
            tap = xp[:, kh:kh + H, kw:kw + W, :]
            conv = conv + jnp.einsum("bhwc,cd->bhwd", tap, w_conv[:, :, kh, kw].T)
    conv = jnp.maximum(conv + b_conv, 0.0)
    feat = conv.mean(axis=(1, 2))
    logits = feat @ w_fc.T + b_fc
    return feat, logits


if __name__ == "__main__":
    key = jax.random.PRNGKey(0)
    k_x, k_wc, k_bc, k_wf, k_bf = jax.random.split(key, 5)

    # deterministic synthetic parameters (torch-style shapes)
    x = jax.random.normal(k_x, (B, C_IN, H, W), dtype=jnp.float32)
    w_conv = 0.1 * jax.random.normal(k_wc, (REDUCTION_DIM, C_IN, KH, KW), dtype=jnp.float32)
    b_conv = 0.01 * jax.random.normal(k_bc, (REDUCTION_DIM,), dtype=jnp.float32)
    w_fc = 0.1 * jax.random.normal(k_wf, (NUM_CLASSES, REDUCTION_DIM), dtype=jnp.float32)
    b_fc = 0.01 * jax.random.normal(k_bf, (NUM_CLASSES,), dtype=jnp.float32)

    feat, logits = jax.jit(base_forward)(x, w_conv, b_conv, w_fc, b_fc)
    jax.block_until_ready((feat, logits))

    assert feat.shape == (B, REDUCTION_DIM) and logits.shape == (B, NUM_CLASSES)

    feat_ref, logits_ref = _reference(x, w_conv, b_conv, w_fc, b_fc)
    assert jnp.allclose(feat, feat_ref, atol=1e-3, rtol=1e-3)
    assert jnp.allclose(logits, logits_ref, atol=1e-3, rtol=1e-3)
    print("KERNEL_OK")
</pallas_src>

<mosaic_0001>
module attributes {stable_mosaic.version = 11 : i64} {
  func.func @base_kernel(%arg0: memref<512x128xf32, #tpu.memory_space<vmem>>, %arg1: memref<128x128xf32, #tpu.memory_space<vmem>>, %arg2: memref<128x128xf32, #tpu.memory_space<vmem>>, %arg3: memref<8x128xf32, #tpu.memory_space<vmem>>, %arg4: memref<8x128xf32, #tpu.memory_space<vmem>>) attributes {dimension_semantics = [], scalar_prefetch = 0 : i64, scratch_operands = 0 : i64, tpu.core_type = #tpu.core_type<tc>} {
    %cst = arith.constant 0.000000e+00 : f32
    %0 = vector.broadcast %cst : f32 to vector<8x128xf32>
    %c0_i32 = arith.constant 0 : i32
    %c2_i32 = arith.constant 2 : i32
    %1 = arith.addi %c0_i32, %c2_i32 : i32
    %c1_i32 = arith.constant 1 : i32
    %2 = scf.for %arg5 = %c0_i32 to %1 step %c1_i32 iter_args(%arg6 = %0) -> (vector<8x128xf32>)  : i32 {
      %c256_i32 = arith.constant 256 : i32
      %7 = arith.muli %arg5, %c256_i32 : i32
      %8 = tpu.assume_multiple %7, 256 : i32
      %9 = arith.index_cast %8 : i32 to index
      %c0_7 = arith.constant 0 : index
      %10 = vector.load %arg0[%9, %c0_7] : memref<512x128xf32, #tpu.memory_space<vmem>>, vector<256x128xf32>
      %c0_8 = arith.constant 0 : index
      %c0_9 = arith.constant 0 : index
      %11 = vector.load %arg1[%c0_8, %c0_9] : memref<128x128xf32, #tpu.memory_space<vmem>>, vector<128x128xf32>
      %cst_10 = arith.constant dense<0.000000e+00> : vector<256x128xf32>
      %12 = tpu.matmul %10, %11, %cst_10 {dimension_numbers = #tpu.dot_dimension_numbers<[1], [0], [0], [1], [0, 0, 1, 1], [], []>} : vector<256x128xf32>, vector<128x128xf32>, vector<256x128xf32> -> vector<256x128xf32>
      %cst_11 = arith.constant 0.000000e+00 : f32
      %13 = vector.broadcast %cst_11 : f32 to vector<256x128xf32>
      %14 = arith.maximumf %12, %13 : vector<256x128xf32>
      %cst_12 = arith.constant dense<0.000000e+00> : vector<128xf32>
      %15 = vector.multi_reduction <add>, %14, %cst_12 [0] : vector<256x128xf32> to vector<128xf32>
      %16 = vector.shape_cast %15 : vector<128xf32> to vector<1x128xf32>
      %cst_13 = arith.constant 3.906250e-03 : f32
      %17 = vector.broadcast %cst_13 : f32 to vector<1x128xf32>
      %18 = arith.mulf %16, %17 : vector<1x128xf32>
      %19 = tpu.iota {dimensions = array<i32: 0>} : vector<8x128xi32>
      %20 = vector.broadcast %arg5 : i32 to vector<8x128xi32>
      %21 = arith.cmpi eq, %19, %20 : vector<8x128xi32>
      %cst_14 = arith.constant 0.000000e+00 : f32
      %22 = vector.shape_cast %18 : vector<1x128xf32> to vector<1x128xf32>
      %23 = vector.broadcast %22 : vector<1x128xf32> to vector<8x128xf32>
      %24 = vector.broadcast %cst_14 : f32 to vector<8x128xf32>
      %25 = arith.select %21, %23, %24 : vector<8x128xi1>, vector<8x128xf32>
      %26 = arith.addf %arg6, %25 : vector<8x128xf32>
      scf.yield %26 : vector<8x128xf32>
    }
    %c2_i32_0 = arith.constant 2 : i32
    %c0 = arith.constant 0 : index
    %c0_1 = arith.constant 0 : index
    %3 = vector.load %arg3[%c0, %c0_1] : memref<8x128xf32, #tpu.memory_space<vmem>>, vector<8x128xf32>
    tpu.vector_store %arg3[%c0, %c0_1], %2 {strides = array<i32>} : memref<8x128xf32, #tpu.memory_space<vmem>>, vector<8x128xf32>,
    %c0_2 = arith.constant 0 : index
    %c0_3 = arith.constant 0 : index
    %4 = vector.load %arg2[%c0_2, %c0_3] : memref<128x128xf32, #tpu.memory_space<vmem>>, vector<128x128xf32>
    %cst_4 = arith.constant dense<0.000000e+00> : vector<8x128xf32>
    %5 = tpu.matmul %2, %4, %cst_4 {dimension_numbers = #tpu.dot_dimension_numbers<[1], [0], [0], [1], [0, 0, 1, 1], [], []>} : vector<8x128xf32>, vector<128x128xf32>, vector<8x128xf32> -> vector<8x128xf32>
    %c0_5 = arith.constant 0 : index
    %c0_6 = arith.constant 0 : index
    %6 = vector.load %arg4[%c0_5, %c0_6] : memref<8x128xf32, #tpu.memory_space<vmem>>, vector<8x128xf32>
    tpu.vector_store %arg4[%c0_5, %c0_6], %5 {strides = array<i32>} : memref<8x128xf32, #tpu.memory_space<vmem>>, vector<8x128xf32>,
    return
  }
}

</mosaic_0001>

<bundles_post_ra>
// kernel: base_forward.1
= control target key start
LH: loop header
LB: loop body
LE: loop exit
PB: predicated region body
PF: predicated region fallthrough
CT: control target
= control target key end

     0   :  { %v796_v0 = vmov 0.0   ;;  %s798_s15 = smov 0   ;;  %s959_s0 = inlined_call_operand.vmem [shape: f32[512,128], index: 0, kind: input, shape index: {}]   ;;  %s960_s1 = inlined_call_operand.vmem [shape: f32[128,128], index: 1, kind: input, shape index: {}]   ;;  %s961_s2 = inlined_call_operand.vmem [shape: f32[128,128], index: 2, kind: input, shape index: {}]   ;;  %s962_s3 = inlined_call_operand.vmem [shape: f32[8,128], index: 3, kind: output, shape index: {0}]   ;;  %s963_s4 = inlined_call_operand.vmem [shape: f32[8,128], index: 4, kind: output, shape index: {1}]  }
   0x1 LB: > { %v57_v1 = vld [vmem:[%s960_s1] sm:$0xff]  ;;  %v58_v2 = vld [vmem:[%s960_s1 + $0x8] sm:$0xff]  ;;  %v59_v3 = vld [vmem:[%s960_s1 + $0x10] sm:$0xff]  ;;  %s480_s28 = sshll.u32 %s766_s15, 8  ;;  %s766_s15 = sphi %s798_s15, %s21_s15   ;;  %v762_v0 = vphi %v796_v0, %v964_v0  }
   0x2   : > { %v661_v4 = vpack.c.bf16 %v58_v2, %v57_v1  ;;  %v60_v5 = vld [vmem:[%s960_s1 + $0x18] sm:$0xff]  ;;  %v61_v7 = vld [vmem:[%s960_s1 + $0x20] sm:$0xff]  ;;  %v62_v8 = vld [vmem:[%s960_s1 + $0x28] sm:$0xff]  ;;  %s828_s5 = scalar_lea.vmem %s959_s0, %s480_s28 }
   0x3   : > { %v665_v6 = vpack.c.bf16 %v60_v5, %v59_v3  ;;  %v669_v9 = vpack.c.bf16 %v62_v8, %v61_v7  ;;  %v25_v10 = vld [vmem:[%s828_s5] sm:$0xff]  ;;  %v63_v11 = vld [vmem:[%s960_s1 + $0x30] sm:$0xff]  ;;  %v64_v12 = vld [vmem:[%s960_s1 + $0x38] sm:$0xff] }
   0x4   : > { %662 = vmatprep.subr.bf16.mxu0 %v661_v4  ;;  %717 = vmatprep.subr.bf16.mxu1 %v661_v4  ;;  %v673_v13 = vpack.c.bf16 %v64_v12, %v63_v11  ;;  %v65_v14 = vld [vmem:[%s960_s1 + $0x40] sm:$0xff]  ;;  %v66_v15 = vld [vmem:[%s960_s1 + $0x48] sm:$0xff]  ;;  %v67_v18 = vld [vmem:[%s960_s1 + $0x50] sm:$0xff] }
   0x5   : > { %664 = vmatpush3.bf16.msra.mxu0 %v661_v4  ;;  %725 = vmatpush3.bf16.msra.mxu1 %v661_v4  ;;  %v41_v16 = vld [vmem:[%s828_s5 + $0x80] sm:$0xff]  ;;  %v677_v17 = vpack.c.bf16 %v66_v15, %v65_v14  ;;  %v68_v19 = vld [vmem:[%s960_s1 + $0x58] sm:$0xff]  ;;  %v70_v22 = vld [vmem:[%s960_s1 + $0x68] sm:$0xff] }
   0x6   : > { %666 = vmatprep.subr.bf16.mxu0 %v665_v6  ;;  %718 = vmatprep.subr.bf16.mxu1 %v665_v6  ;;  %v681_v20 = vpack.c.bf16 %v68_v19, %v67_v18  ;;  %v69_v21 = vld [vmem:[%s960_s1 + $0x60] sm:$0xff]  ;;  %v71_v24 = vld [vmem:[%s960_s1 + $0x70] sm:$0xff]  ;;  %v72_v25 = vld [vmem:[%s960_s1 + $0x78] sm:$0xff] }
   0x7   : > { %578 = vmatprep.mubr.f32.mxu0 %v25_v10  ;;  %602 = vmatprep.mubr.f32.mxu1 %v41_v16  ;;  %v685_v23 = vpack.c.bf16 %v70_v22, %v69_v21  ;;  %v689_v26 = vpack.c.bf16 %v72_v25, %v71_v24  ;;  %v26_v27 = vld [vmem:[%s828_s5 + $0x8] sm:$0xff]  ;;  %v27_v29 = vld [vmem:[%s828_s5 + $0x10] sm:$0xff]  ;;  %v28_v31 = vld [vmem:[%s828_s5 + $0x18] sm:$0xff] }
   0x8   : > { %v42_v28 = vld [vmem:[%s828_s5 + $0x88] sm:$0xff]  ;;  %v43_v30 = vld [vmem:[%s828_s5 + $0x90] sm:$0xff]  ;;  %v44_v32 = vld [vmem:[%s828_s5 + $0x98] sm:$0xff] }
   0x9   : > { %668 = vmatpush3.bf16.msra.mxu0 %v665_v6  ;;  %726 = vmatpush3.bf16.msra.mxu1 %v665_v6  ;;  %v29_v33 = vld [vmem:[%s828_s5 + $0x20] sm:$0xff]  ;;  %v30_v35 = vld [vmem:[%s828_s5 + $0x28] sm:$0xff]  ;;  %v31_v37 = vld [vmem:[%s828_s5 + $0x30] sm:$0xff] }
   0xa   : > { %670 = vmatprep.subr.bf16.mxu0 %v669_v9  ;;  %719 = vmatprep.subr.bf16.mxu1 %v669_v9  ;;  %v45_v34 = vld [vmem:[%s828_s5 + $0xa0] sm:$0xff]  ;;  %v46_v36 = vld [vmem:[%s828_s5 + $0xa8] sm:$0xff]  ;;  %v47_v38 = vld [vmem:[%s828_s5 + $0xb0] sm:$0xff] }
   0xb   : > { %v32_v39 = vld [vmem:[%s828_s5 + $0x38] sm:$0xff]  ;;  %v33_v41 = vld [vmem:[%s828_s5 + $0x40] sm:$0xff]  ;;  %v34_v43 = vld [vmem:[%s828_s5 + $0x48] sm:$0xff] }
   0xc   : > { %v48_v40 = vld [vmem:[%s828_s5 + $0xb8] sm:$0xff]  ;;  %v49_v42 = vld [vmem:[%s828_s5 + $0xc0] sm:$0xff]  ;;  %v50_v44 = vld [vmem:[%s828_s5 + $0xc8] sm:$0xff] }
   0xd   : > { %672 = vmatpush3.bf16.msra.mxu0 %v669_v9  ;;  %727 = vmatpush3.bf16.msra.mxu1 %v669_v9  ;;  %v35_v45 = vld [vmem:[%s828_s5 + $0x50] sm:$0xff]  ;;  %v36_v47 = vld [vmem:[%s828_s5 + $0x58] sm:$0xff]  ;;  %v37_v49 = vld [vmem:[%s828_s5 + $0x60] sm:$0xff] }
   0xe   : > { %674 = vmatprep.subr.bf16.mxu0 %v673_v13  ;;  %720 = vmatprep.subr.bf16.mxu1 %v673_v13  ;;  %v51_v46 = vld [vmem:[%s828_s5 + $0xd0] sm:$0xff]  ;;  %v52_v48 = vld [vmem:[%s828_s5 + $0xd8] sm:$0xff]  ;;  %v53_v50 = vld [vmem:[%s828_s5 + $0xe0] sm:$0xff] }
   0xf   : > { %v38_v51 = vld [vmem:[%s828_s5 + $0x68] sm:$0xff]  ;;  %v39_v53 = vld [vmem:[%s828_s5 + $0x70] sm:$0xff]  ;;  %v40_v55 = vld [vmem:[%s828_s5 + $0x78] sm:$0xff] }
  0x10   : > { %v54_v52 = vld [vmem:[%s828_s5 + $0xe8] sm:$0xff]  ;;  %v55_v54 = vld [vmem:[%s828_s5 + $0xf0] sm:$0xff]  ;;  %v56_v56 = vld [vmem:[%s828_s5 + $0xf8] sm:$0xff] }
  0x11   : > { %676 = vmatpush3.bf16.msra.mxu0 %v673_v13  ;;  %728 = vmatpush3.bf16.msra.mxu1 %v673_v13 }
  0x12   : > { %678 = vmatprep.subr.bf16.mxu0 %v677_v17  ;;  %721 = vmatprep.subr.bf16.mxu1 %v677_v17 }
  0x15   : > { %680 = vmatpush3.bf16.msra.mxu0 %v677_v17  ;;  %729 = vmatpush3.bf16.msra.mxu1 %v677_v17 }
  0x16   : > { %682 = vmatprep.subr.bf16.mxu0 %v681_v20  ;;  %722 = vmatprep.subr.bf16.mxu1 %v681_v20 }
  0x19   : > { %684 = vmatpush3.bf16.msra.mxu0 %v681_v20  ;;  %730 = vmatpush3.bf16.msra.mxu1 %v681_v20 }
  0x1a   : > { %686 = vmatprep.subr.bf16.mxu0 %v685_v23  ;;  %723 = vmatprep.subr.bf16.mxu1 %v685_v23 }
  0x1d   : > { %688 = vmatpush3.bf16.msra.mxu0 %v685_v23  ;;  %731 = vmatpush3.bf16.msra.mxu1 %v685_v23 }
  0x1e   : > { %690 = vmatprep.subr.bf16.mxu0 %v689_v26  ;;  %724 = vmatprep.subr.bf16.mxu1 %v689_v26 }
  0x21   : > { %692 = vmatpush3.bf16.msra.mxu0 %v689_v26  ;;  %732 = vmatpush3.bf16.msra.mxu1 %v689_v26 }
  0x24   : > { %579 = vmatmul.mubr.f32.vlgmr.msra.gmra.mrb[0].mxu0 %v26_v27  ;;  %603 = vmatmul.mubr.f32.vlgmr.msra.gmra.mrb[0].mxu1 %v42_v28 }
  0x25   : > { %581 = vmatprep.mubr.f32.mxu0 %v27_v29  ;;  %605 = vmatprep.mubr.f32.mxu1 %v43_v30 }
  0x28   : > { %582 = vmatmul.mubr.f32.gmra.mrb[2].mxu0 %v28_v31  ;;  %606 = vmatmul.mubr.f32.gmra.mrb[2].mxu1 %v44_v32 }
  0x29   : > { %584 = vmatprep.mubr.f32.mxu0 %v29_v33  ;;  %608 = vmatprep.mubr.f32.mxu1 %v45_v34 }
  0x2c   : > { %585 = vmatmul.mubr.f32.gmra.mrb[4].mxu0 %v30_v35  ;;  %609 = vmatmul.mubr.f32.gmra.mrb[4].mxu1 %v46_v36 }
  0x2d   : > { %587 = vmatprep.mubr.f32.mxu0 %v31_v37  ;;  %611 = vmatprep.mubr.f32.mxu1 %v47_v38 }
  0x30   : > { %588 = vmatmul.mubr.f32.gmra.mrb[6].mxu0 %v32_v39  ;;  %612 = vmatmul.mubr.f32.gmra.mrb[6].mxu1 %v48_v40 }
  0x31   : > { %590 = vmatprep.mubr.f32.mxu0 %v33_v41  ;;  %614 = vmatprep.mubr.f32.mxu1 %v49_v42 }
  0x34   : > { %591 = vmatmul.mubr.f32.gmra.mrb[8].mxu0 %v34_v43  ;;  %615 = vmatmul.mubr.f32.gmra.mrb[8].mxu1 %v50_v44 }
  0x35   : > { %593 = vmatprep.mubr.f32.mxu0 %v35_v45  ;;  %617 = vmatprep.mubr.f32.mxu1 %v51_v46 }
  0x38   : > { %594 = vmatmul.mubr.f32.gmra.mrb[10].mxu0 %v36_v47  ;;  %618 = vmatmul.mubr.f32.gmra.mrb[10].mxu1 %v52_v48 }
  0x39   : > { %596 = vmatprep.mubr.f32.mxu0 %v37_v49  ;;  %620 = vmatprep.mubr.f32.mxu1 %v53_v50 }
  0x3c   : > { %597 = vmatmul.mubr.f32.gmra.mrb[12].mxu0 %v38_v51  ;;  %621 = vmatmul.mubr.f32.gmra.mrb[12].mxu1 %v54_v52 }
  0x3d   : > { %599 = vmatprep.mubr.f32.mxu0 %v39_v53  ;;  %623 = vmatprep.mubr.f32.mxu1 %v55_v54 }
  0x40   : > { %600 = vmatmul.mubr.f32.gmra.mrb[14].mxu0 %v40_v55  ;;  %624 = vmatmul.mubr.f32.gmra.mrb[14].mxu1 %v56_v56 }
  0xf7   : > { %v580_v57 = vpop.f32.mrb[0].mxu0  ;;  %v892_v58 = vpop.f32.mrb[0].mxu1 }
  0xf8   : > { %v299_v59 = vmax.f32 %v580_v57, 0.0  ;;  %v139_v60 = vpop.f32.mrb[1].mxu0  ;;  %v219_v61 = vpop.f32.mrb[1].mxu1 }
  0xf9   : > { %v298_v62 = vmax.f32 %v139_v60, 0.0  ;;  %v314_v56 = vmax.f32 %v219_v61, 0.0 }
  0xfb   : > { %v330_v63 = vadd.f32 %v299_v59, %v298_v62  ;;  %v583_v1 = vpop.f32.mrb[2].mxu0  ;;  %v894_v2 = vpop.f32.mrb[2].mxu1  ;;  %v315_v59 = vmax.f32 %v892_v58, 0.0 }
  0xfc   : > { %v149_v3 = vpop.f32.mrb[3].mxu0  ;;  %v229_v4 = vpop.f32.mrb[3].mxu1  ;;  %v301_v6 = vmax.f32 %v583_v1, 0.0  ;;  %v317_v1 = vmax.f32 %v894_v2, 0.0 }
  0xfd   : > { %v300_v5 = vmax.f32 %v149_v3, 0.0  ;;  %v316_v62 = vmax.f32 %v229_v4, 0.0 }
  0xff   : > { %v331_v7 = vadd.f32 %v330_v63, %v300_v5  ;;  %v586_v8 = vpop.f32.mrb[4].mxu0  ;;  %v610_v9 = vpop.f32.mrb[4].mxu1 }
 0x100   : > { %v159_v10 = vpop.f32.mrb[5].mxu0  ;;  %v239_v11 = vpop.f32.mrb[5].mxu1  ;;  %v303_v14 = vmax.f32 %v586_v8, 0.0 }
 0x101   : > { %v302_v12 = vmax.f32 %v159_v10, 0.0  ;;  %v332_v13 = vadd.f32 %v331_v7, %v301_v6  ;;  %v318_v5 = vmax.f32 %v239_v11, 0.0  ;;  %v319_v7 = vmax.f32 %v610_v9, 0.0 }
 0x103   : > { %v333_v15 = vadd.f32 %v332_v13, %v302_v12  ;;  %v589_v16 = vpop.f32.mrb[6].mxu0  ;;  %v613_v17 = vpop.f32.mrb[6].mxu1 }
 0x104   : > { %v169_v18 = vpop.f32.mrb[7].mxu0  ;;  %v249_v19 = vpop.f32.mrb[7].mxu1  ;;  %v305_v22 = vmax.f32 %v589_v16, 0.0  ;;  %v321_v13 = vmax.f32 %v613_v17, 0.0 }
 0x105   : > { %v304_v20 = vmax.f32 %v169_v18, 0.0  ;;  %v334_v21 = vadd.f32 %v333_v15, %v303_v14  ;;  %v320_v10 = vmax.f32 %v249_v19, 0.0 }
 0x107   : > { %v335_v23 = vadd.f32 %v334_v21, %v304_v20  ;;  %v592_v24 = vpop.f32.mrb[8].mxu0  ;;  %v616_v25 = vpop.f32.mrb[8].mxu1 }
 0x108   : > { %v179_v26 = vpop.f32.mrb[9].mxu0  ;;  %v259_v27 = vpop.f32.mrb[9].mxu1  ;;  %v307_v30 = vmax.f32 %v592_v24, 0.0  ;;  %v323_v61 = vmax.f32 %v616_v25, 0.0 }
 0x109   : > { %v306_v28 = vmax.f32 %v179_v26, 0.0  ;;  %v336_v29 = vadd.f32 %v335_v23, %v305_v22  ;;  %v322_v15 = vmax.f32 %v259_v27, 0.0  ;;  %v368_v27 = vlaneseq }
 0x10b   : > { %v337_v31 = vadd.f32 %v336_v29, %v306_v28  ;;  %v595_v32 = vpop.f32.mrb[10].mxu0  ;;  %v619_v33 = vpop.f32.mrb[10].mxu1 }
 0x10c   : > { %v189_v34 = vpop.f32.mrb[11].mxu0  ;;  %v269_v35 = vpop.f32.mrb[11].mxu1  ;;  %v309_v38 = vmax.f32 %v595_v32, 0.0  ;;  %v325_v21 = vmax.f32 %v619_v33, 0.0 }
 0x10d   : > { %v308_v36 = vmax.f32 %v189_v34, 0.0  ;;  %v338_v37 = vadd.f32 %v337_v31, %v307_v30  ;;  %v324_v20 = vmax.f32 %v269_v35, 0.0  ;;  %v369_v31 = vshrl.u32 %v368_v27, 7 }
 0x10e   : > { %v370_v34 = vstv %s766_s15  ;;  %s21_s15 = sadd.s32 1, %s766_s15  }
 0x10f   : > { %v339_v39 = vadd.f32 %v338_v37, %v308_v36  ;;  %v598_v40 = vpop.f32.mrb[12].mxu0  ;;  %v622_v41 = vpop.f32.mrb[12].mxu1  ;;  %vm371_vm0 = vcmp.eq.s32.totalorder %v369_v31, %v370_v34  ;;  %p18_p0 = scmp.ge.s32.totalorder %s21_s15, 2  }
 0x110   : > { %v199_v42 = vpop.f32.mrb[13].mxu0  ;;  %v279_v43 = vpop.f32.mrb[13].mxu1  ;;  %v311_v46 = vmax.f32 %v598_v40, 0.0  ;;  %v327_v23 = vmax.f32 %v622_v41, 0.0  ;;  %v768_v40 = vmov (%p18_p0), 0.0|0.0   ;;  %vm769_vm1 = vmmov (%p18_p0), 0  }
 0x111   : > { %v310_v44 = vmax.f32 %v199_v42, 0.0  ;;  %v340_v45 = vadd.f32 %v339_v39, %v309_v38  ;;  %v326_v22 = vmax.f32 %v279_v43, 0.0  ;;  %v375_v38 = vld [vmem:[%s961_s2] sm:$0xff] (%p18_p0)  ;;  %v377_v39 = vld [vmem:[%s961_s2 + $0x10] sm:$0xff] (%p18_p0)  ;;  %693 = vmatprep.subr.bf16.mxu0 (%p18_p0), %v768_v40  ;;  %v378_v42 = vld [vmem:[%s961_s2 + $0x18] sm:$0xff] (%p18_p0)  ;;  %v770_v43 = vmov (%p18_p0), 0.0  }
 0x112   :  { %658 = vmatprep.mubr.msk.f32.mxu0 (%p18_p0), %vm769_vm1, %v770_v43 }
 0x113   : > { %v341_v47 = vadd.f32 %v340_v45, %v310_v44  ;;  %v601_v48 = vpop.f32.mrb[14].mxu0  ;;  %v625_v49 = vpop.f32.mrb[14].mxu1  ;;  %v697_v44 = vpack.c.bf16 (%p18_p0), %v378_v42, %v377_v39  ;;  %v379_v45 = vld [vmem:[%s961_s2 + $0x20] sm:$0xff] (%p18_p0) }
 0x114   : > { %v209_v50 = vpop.f32.mrb[15].mxu0  ;;  %v289_v51 = vpop.f32.mrb[15].mxu1  ;;  %v313_v54 = vmax.f32 %v601_v48, 0.0  ;;  %v329_v26 = vmax.f32 %v625_v49, 0.0  ;;  %v381_v48 = vld [vmem:[%s961_s2 + $0x30] sm:$0xff] (%p18_p0)  ;;  %v382_v49 = vld [vmem:[%s961_s2 + $0x38] sm:$0xff] (%p18_p0) }
 0x115   : > { %v312_v52 = vmax.f32 %v209_v50, 0.0  ;;  %v342_v53 = vadd.f32 %v341_v47, %v311_v46  ;;  %v328_v24 = vmax.f32 %v289_v51, 0.0  ;;  %v380_v46 = vld [vmem:[%s961_s2 + $0x28] sm:$0xff] (%p18_p0)  ;;  %v703_v50 = vpack.c.bf16 (%p18_p0), %v382_v49, %v381_v48  ;;  %v383_v51 = vld [vmem:[%s961_s2 + $0x40] sm:$0xff] (%p18_p0) }
 0x116   :  { %v700_v47 = vpack.c.bf16 (%p18_p0), %v380_v46, %v379_v45 }
 0x117   : > { %v343_v55 = vadd.f32 %v342_v53, %v312_v52  ;;  %v384_v52 = vld [vmem:[%s961_s2 + $0x48] sm:$0xff] (%p18_p0) }
 0x118   :  { %v706_v53 = vpack.c.bf16 (%p18_p0), %v384_v52, %v383_v51 }
 0x119   : > { %v344_v57 = vadd.f32 %v343_v55, %v313_v54  ;;  %v385_v54 = vld [vmem:[%s961_s2 + $0x50] sm:$0xff] (%p18_p0)  ;;  %v386_v55 = vld [vmem:[%s961_s2 + $0x58] sm:$0xff] (%p18_p0) }
 0x11b   : > { %v345_v60 = vadd.f32 %v344_v57, %v314_v56  ;;  %v709_v56 = vpack.c.bf16 (%p18_p0), %v386_v55, %v385_v54  ;;  %v387_v57 = vld [vmem:[%s961_s2 + $0x60] sm:$0xff] (%p18_p0) }
 0x11d   : > { %v346_v63 = vadd.f32 %v345_v60, %v315_v59  ;;  %v388_v59 = vld [vmem:[%s961_s2 + $0x68] sm:$0xff] (%p18_p0) }
 0x11e   :  { %v712_v60 = vpack.c.bf16 (%p18_p0), %v388_v59, %v387_v57 }
 0x11f   : > { %v347_v3 = vadd.f32 %v346_v63, %v316_v62  ;;  %v389_v62 = vld [vmem:[%s961_s2 + $0x70] sm:$0xff] (%p18_p0)  ;;  %v390_v63 = vld [vmem:[%s961_s2 + $0x78] sm:$0xff] (%p18_p0) }
 0x121   : > { %v348_v6 = vadd.f32 %v347_v3, %v317_v1  ;;  %v715_v1 = vpack.c.bf16 (%p18_p0), %v390_v63, %v389_v62 }
 0x123   : > { %v349_v8 = vadd.f32 %v348_v6, %v318_v5 }
 0x125   : > { %v350_v12 = vadd.f32 %v349_v8, %v319_v7 }
 0x127   : > { %v351_v14 = vadd.f32 %v350_v12, %v320_v10 }
 0x129   : > { %v352_v16 = vadd.f32 %v351_v14, %v321_v13 }
 0x12b   : > { %v353_v18 = vadd.f32 %v352_v16, %v322_v15 }
 0x12d   : > { %v354_v58 = vadd.f32 %v353_v18, %v323_v61 }
 0x12f   : > { %v355_v4 = vadd.f32 %v354_v58, %v324_v20 }
 0x131   : > { %v356_v2 = vadd.f32 %v355_v4, %v325_v21 }
 0x133   : > { %v357_v11 = vadd.f32 %v356_v2, %v326_v22 }
 0x135   : > { %v358_v9 = vadd.f32 %v357_v11, %v327_v23 }
 0x137   : > { %v359_v19 = vadd.f32 %v358_v9, %v328_v24 }
 0x139   : > { %v360_v28 = vadd.f32 %v359_v19, %v329_v26 }
 0x13b   : > { %v361_v17 = vrot.slane %v360_v28, 4 }
 0x13d   : > { %v362_v29 = vadd.f32 %v361_v17, %v360_v28 }
 0x13f   : > { %v363_v30 = vrot.slane %v362_v29, 2 }
 0x141   : > { %v364_v25 = vadd.f32 %v363_v30, %v362_v29 }
 0x143   : > { %v365_v32 = vrot.slane %v364_v25, 1 }
 0x145   : > { %v366_v33 = vadd.f32 %v365_v32, %v364_v25 }
 0x146   :  { %20 = sbr.rel (!%p18_p0) target bundleno = 1 (0x1), region = 48 }
 0x147   : > { %v367_v35 = vmul.f32 0.00390625, %v366_v33 }
 0x149   : > { %v372_v36 = vsel %vm371_vm0, %v367_v35, 0.0 }
 0x14a   : > { %v373_v37 = vadd.f32 %v762_v0, %v372_v36  }
 0x14c   : > { %v964_v0 = vmov %v373_v37  ;;  %374 = vst [vmem:[%s962_s3] sm:$0xff] (%p18_p0), %v373_v37 }
 0x14d   :  { %v376_v0 = vld [vmem:[%s961_s2 + $0x8] sm:$0xff] }
 0x14e   :  { %v694_v41 = vpack.c.bf16 %v376_v0, %v375_v38 }
 0x150   :  { %695 = vmatpush3.bf16.msra.mxu0 %v694_v41 }
 0x151   :  { %696 = vmatprep.subr.bf16.mxu0 %v768_v40 }
 0x154   :  { %698 = vmatpush3.bf16.msra.mxu0 %v697_v44 }
 0x155   :  { %699 = vmatprep.subr.bf16.mxu0 %v768_v40 }
 0x158   :  { %701 = vmatpush3.bf16.msra.mxu0 %v700_v47 }
 0x159   :  { %702 = vmatprep.subr.bf16.mxu0 %v768_v40 }
 0x15c   :  { %704 = vmatpush3.bf16.msra.mxu0 %v703_v50 }
 0x15d   :  { %705 = vmatprep.subr.bf16.mxu0 %v768_v40 }
 0x160   :  { %707 = vmatpush3.bf16.msra.mxu0 %v706_v53 }
 0x161   :  { %708 = vmatprep.subr.bf16.mxu0 %v768_v40 }
 0x164   :  { %710 = vmatpush3.bf16.msra.mxu0 %v709_v56 }
 0x165   :  { %711 = vmatprep.subr.bf16.mxu0 %v768_v40 }
 0x168   :  { %713 = vmatpush3.bf16.msra.mxu0 %v712_v60 }
 0x169   :  { %714 = vmatprep.subr.bf16.mxu0 %v768_v40 }
 0x16c   :  { %716 = vmatpush3.bf16.msra.mxu0 %v715_v1 }
 0x16f   :  { %659 = vmatmul.mubr.f32.vlgmr.msra.gmra.mrb[0].mxu0 %v373_v37 }
 0x242   :  { %v457_v3 = vpop.f32.mrb[0].mxu0 }
 0x243   :  { %461 = vst [vmem:[%s963_s4] sm:$0xff] %v457_v3  ;;  %v660_v5 = vpop.f32.mrb[1].mxu0 }

</bundles_post_ra>
